<compile_context>
chip_gen: v7x
topology: tpu7x:2x2x1
jax: 0.10.0
libtpu: 0.0.40
codegen_flags: <defaults>
</compile_context>

<pallas_src>
import jax
import jax.numpy as jnp
from jax import lax
from jax.experimental import pallas as pl
from jax.experimental.pallas import tpu as pltpu

LEAKY_SLOPE = 0.2
BN_EPS = 1e-5
LANE = 128


def _cdiv(a, b):
    return -(-a // b)


def _round_up(x, m):
    return _cdiv(x, m) * m


def _leaky_relu(x):
    return jnp.where(x >= 0, x, LEAKY_SLOPE * x)


def _vmem_limit_bytes():
    """Per-generation VMEM budget: ~96 MiB on 128-MiB parts, ~48 MiB on v7x."""
    cap = 0
    try:
        info = pltpu.get_tpu_info()
        cap = int(getattr(info, "vmem_capacity_bytes", 0) or 0)
    except Exception:
        cap = 0
    if cap <= 0:
        cap = 64 * 1024 * 1024            # conservative fallback (v7x per-core VMEM)
    return int(min(cap * 3 // 4, 100 * 1024 * 1024))


# ---------------------------------------------------------------------------
# Kernel 1: fused conv (transposed im2col matmul) + folded BN + LeakyReLU.
#   out_T[Cout, tm] = leaky_relu( W_aug[Cout, Kp] @ patches_T[Kp, tm] )
# Bias enters through a ones-row of the patches, so the kernel is a single
# bf16 MXU matmul (f32 accumulate) + a VPU select epilogue, lane-dense output.
# ---------------------------------------------------------------------------
def _convT_kernel(p_ref, w_ref, o_ref):
    acc = jnp.dot(w_ref[...], p_ref[...], preferred_element_type=jnp.float32)
    o_ref[...] = _leaky_relu(acc).astype(o_ref.dtype)


def _choose_tiles(M, Kp, Cout, vmem_limit):
    Mp = _round_up(M, LANE)
    # bytes per lane column: double-buffered bf16 patch tile + double-buffered f32 out
    per_col = 2 * (Kp * 2) + 2 * (Cout * 4) + 1
    max_tm = max(LANE, ((vmem_limit // 4) // per_col) // LANE * LANE)
    max_tm = min(max_tm, 2048)
    g = _cdiv(Mp, max_tm)
    if g < 2 and Mp >= 2 * LANE:
        g = 2                         # >= 2 grid steps so both v7x TensorCores work
    tm = _round_up(_cdiv(Mp, g), LANE)
    return tm, g, tm * g


def _augment_patches(pat, Kp, Mp):
    """Append the bias ones-row and zero-pad to (Kp, Mp)."""
    K, M = pat.shape
    pat = jnp.concatenate([pat, jnp.ones((1, M), pat.dtype)], axis=0)
    return jnp.pad(pat, ((0, Kp - (K + 1)), (0, Mp - M)))


def _fused_conv_matmul(pat, w_aug, vmem_limit):
    """pat: (K, M) f32 transposed-im2col patches.  w_aug: (Cout, Kp) bf16."""
    Cout, Kp = w_aug.shape
    K, M = pat.shape
    tm, g, Mp = _choose_tiles(M, Kp, Cout, vmem_limit)
    p = _augment_patches(pat, Kp, Mp).astype(jnp.bfloat16)
    out = pl.pallas_call(
        _convT_kernel,
        out_shape=jax.ShapeDtypeStruct((Cout, Mp), jnp.float32),
        grid_spec=pltpu.PrefetchScalarGridSpec(
            num_scalar_prefetch=0,
            grid=(g,),
            in_specs=[
                pl.BlockSpec((Kp, tm), lambda i: (0, i)),     # patches, lane-dense
                pl.BlockSpec((Cout, Kp), lambda i: (0, 0)),   # folded conv+BN(+bias)
            ],
            out_specs=pl.BlockSpec((Cout, tm), lambda i: (0, i)),  # lane-dense stores
        ),
        compiler_params=pltpu.CompilerParams(
            dimension_semantics=("parallel",),
            vmem_limit_bytes=vmem_limit,
        ),
        cost_estimate=pl.CostEstimate(
            flops=2 * Cout * Kp * Mp,
            transcendentals=0,
            bytes_accessed=2 * Kp * Mp + 2 * Cout * Kp + 4 * Cout * Mp,
        ),
    )(p, w_aug)
    return out if Mp == M else out[:, :M]


# ---------------------------------------------------------------------------
# Kernel 2: fused, batched head (single grid step, batch on the lane axis):
#   last 3x3 conv (stride 2) + BN + LReLU   (bias via ones-row of p2)
#   1x1 conv (C2->base) + BN + LReLU
#   1x1 conv (base->1, +bias)
#   flatten -> fc1 -> fc2 -> tanh  as block-diagonal (kron) matmuls over N
# ---------------------------------------------------------------------------
def _head_kernel(p2_ref, w2_ref, w3_ref, b3_ref, w4_ref, b4_ref,
                 k1_ref, b1_ref, k2_ref, b2_ref, o_ref):
    f = jnp.dot(w2_ref[...], p2_ref[...], preferred_element_type=jnp.float32)
    f = _leaky_relu(f)                                                     # (C2, M2p)
    h3 = jnp.dot(w3_ref[...], f, preferred_element_type=jnp.float32) + b3_ref[...]
    h3 = _leaky_relu(h3)                                                   # (base, M2p)
    v = jnp.dot(w4_ref[...], h3, preferred_element_type=jnp.float32) + b4_ref[...]   # (1, M2p)
    z = jnp.dot(v, k1_ref[...], preferred_element_type=jnp.float32) + b1_ref[...]    # (1, N*R)
    z = jnp.dot(z, k2_ref[...], preferred_element_type=jnp.float32) + b2_ref[...]    # (1, N)
    o_ref[...] = jnp.tanh(z).astype(o_ref.dtype)


def _head_call(p2, hd, n_batch, vmem_limit):
    K2p, M2p = p2.shape
    C2 = hd["conv_w"].shape[0]
    base = hd["w3"].shape[0]
    NR = hd["fc1_kron"].shape[1]
    out = pl.pallas_call(
        _head_kernel,
        out_shape=jax.ShapeDtypeStruct((1, n_batch), jnp.float32),
        grid_spec=pltpu.PrefetchScalarGridSpec(
            num_scalar_prefetch=0,
            grid=(1,),
            in_specs=[
                pl.BlockSpec((K2p, M2p), lambda i: (0, 0)),   # last-conv patches (bf16)
                pl.BlockSpec((C2, K2p), lambda i: (0, 0)),    # last-conv weights (bf16)
                pl.BlockSpec((base, C2), lambda i: (0, 0)),   # 1x1 conv3 (BN folded)
                pl.BlockSpec((base, 1), lambda i: (0, 0)),    # conv3 bias column
                pl.BlockSpec((1, base), lambda i: (0, 0)),    # 1x1 conv4
                pl.BlockSpec((1, 1), lambda i: (0, 0)),       # conv4 bias
                pl.BlockSpec((M2p, NR), lambda i: (0, 0)),    # I_N (x) fc1_w^T (padded)
                pl.BlockSpec((1, NR), lambda i: (0, 0)),      # tiled fc1 bias
                pl.BlockSpec((NR, n_batch), lambda i: (0, 0)),  # I_N (x) fc2_w^T
                pl.BlockSpec((1, n_batch), lambda i: (0, 0)),   # tiled fc2 bias
            ],
            out_specs=pl.BlockSpec((1, n_batch), lambda i: (0, 0)),
        ),
        compiler_params=pltpu.CompilerParams(
            dimension_semantics=("arbitrary",),
            vmem_limit_bytes=vmem_limit,
        ),
    )(p2, hd["conv_w"], hd["w3"], hd["b3"], hd["w4"], hd["b4"],
      hd["fc1_kron"], hd["fc1_b_t"], hd["fc2_kron"], hd["fc2_b_t"])
    return out.reshape(n_batch, 1)


# ---------------------------------------------------------------------------
# Wrapper: transposed im2col, parameter folding, layer plumbing
# ---------------------------------------------------------------------------
def _im2col_T(x_cnhw, ksize, stride, pad):
    """x: (C, N, H, W) -> patches (k*k*C, N*Ho*Wo); K ordered as (dy, dx, ci)."""
    C, N, H, W = x_cnhw.shape
    Ho = (H + 2 * pad - ksize) // stride + 1
    Wo = (W + 2 * pad - ksize) // stride + 1
    xp = jnp.pad(x_cnhw, ((0, 0), (0, 0), (pad, pad), (pad, pad)))
    rows = []
    for dy in range(ksize):
        for dx in range(ksize):
            rows.append(xp[:, :, dy:dy + stride * Ho:stride,
                           dx:dx + stride * Wo:stride])
    pat = jnp.concatenate(rows, axis=0)                  # (k*k*C, N, Ho, Wo)
    return pat.reshape(ksize * ksize * C, N * Ho * Wo), Ho, Wo


def _fold_conv_bn_T(w_oihw, gamma, beta, mean, var):
    """Fold inference BN into a (Cout, Kp) weight; K ordered (dy,dx,ci) to match
    _im2col_T; bias appended as an extra column paired with the patches' ones row."""
    Cout, Cin, kh, kw = w_oihw.shape
    scale = gamma / jnp.sqrt(var + BN_EPS)
    w_t = jnp.transpose(w_oihw, (0, 2, 3, 1)).reshape(Cout, kh * kw * Cin)
    w_t = w_t * scale[:, None]
    bias = beta - mean * scale
    w_aug = jnp.concatenate([w_t, bias[:, None]], axis=1)        # (Cout, K+1)
    Kp = _round_up(w_aug.shape[1], 8)
    return jnp.pad(w_aug, ((0, 0), (0, Kp - w_aug.shape[1])))


def discriminator_forward(x, params):
    """x: (N, 3, H, W) f32  ->  tanh(fc2(fc1(flatten(model(x))))) of shape (N, 1)."""
    n_batch = x.shape[0]
    vmem_limit = params["vmem_limit"]
    h = jnp.transpose(x, (1, 0, 2, 3)).astype(jnp.float32)       # (C, N, H, W)

    for layer in params["conv_stack"]:                           # all 3x3 layers but last
        pat, Ho, Wo = _im2col_T(h, layer["k"], layer["s"], layer["p"])
        cout = layer["w_aug"].shape[0]
        out = _fused_conv_matmul(pat, layer["w_aug"], vmem_limit)
        h = out.reshape(cout, n_batch, Ho, Wo)                   # free reshape

    hd = params["head"]                                          # last 3x3 conv + tail
    pat2, _, _ = _im2col_T(h, hd["conv_k"], hd["conv_s"], hd["conv_p"])
    K2p = hd["conv_w"].shape[1]
    M2p = hd["fc1_kron"].shape[0]
    p2 = _augment_patches(pat2, K2p, M2p).astype(jnp.bfloat16)
    return _head_call(p2, hd, n_batch, vmem_limit)


# ---------------------------------------------------------------------------
if __name__ == "__main__":
    # Config consistent with the module: resolution=16, num_downsample=2,
    # base_channels=8, norm=True, snorm=False  ->  output_resolution R = 4.
    resolution, num_downsample, base_channels = 16, 2, 8
    N = 2
    R = resolution // (2 ** num_downsample)
    P = R * R

    key = jax.random.PRNGKey(0)
    keys = iter(jax.random.split(key, 64))

    def nrm(shape, scale=0.1):
        return scale * jax.random.normal(next(keys), shape, dtype=jnp.float32)

    x = jax.random.normal(next(keys), (N, 3, resolution, resolution), dtype=jnp.float32)

    # --- raw (PyTorch-layout) parameters -----------------------------------
    conv_cfgs = [(3, base_channels, 3, 1, 1)]
    c = base_channels
    for _ in range(num_downsample):
        conv_cfgs.append((c, 2 * c, 3, 2, 1))
        c *= 2
    raw_convs = []
    for (cin, cout, k, s, p) in conv_cfgs:
        raw_convs.append(dict(
            w=nrm((cout, cin, k, k)),
            gamma=1.0 + nrm((cout,)), beta=nrm((cout,)),
            mean=nrm((cout,)),
            var=0.5 + jax.random.uniform(next(keys), (cout,), dtype=jnp.float32),
            k=k, s=s, p=p))

    C2 = c
    w3 = nrm((base_channels, C2, 1, 1))
    g3, be3 = 1.0 + nrm((base_channels,)), nrm((base_channels,))
    mu3 = nrm((base_channels,))
    va3 = 0.5 + jax.random.uniform(next(keys), (base_channels,), dtype=jnp.float32)
    w4, b4 = nrm((1, base_channels, 1, 1)), nrm((1,))
    fc1_w, fc1_b = nrm((R, P)), nrm((R,))
    fc2_w, fc2_b = nrm((1, R)), nrm((1,))

    # --- Pallas-friendly (folded, bf16) parameters --------------------------
    vmem_limit = _vmem_limit_bytes()

    conv_stack = []
    for lc in raw_convs[:-1]:                  # all 3x3 layers except the last one
        w_aug = _fold_conv_bn_T(lc["w"], lc["gamma"], lc["beta"], lc["mean"], lc["var"])
        conv_stack.append(dict(w_aug=w_aug.astype(jnp.bfloat16),
                               k=lc["k"], s=lc["s"], p=lc["p"]))

    last = raw_convs[-1]                       # fused into the head kernel
    conv_w = _fold_conv_bn_T(last["w"], last["gamma"], last["beta"],
                             last["mean"], last["var"]).astype(jnp.bfloat16)

    scale3 = g3 / jnp.sqrt(va3 + BN_EPS)
    M2p = _round_up(N * P, LANE)
    fc1_kron = jnp.kron(jnp.eye(N, dtype=jnp.float32), fc1_w.T)      # (N*P, N*R)
    fc1_kron = jnp.pad(fc1_kron, ((0, M2p - N * P), (0, 0)))         # (M2p, N*R)
    fc2_kron = jnp.kron(jnp.eye(N, dtype=jnp.float32), fc2_w.T)      # (N*R, N)

    head = dict(
        conv_w=conv_w, conv_k=last["k"], conv_s=last["s"], conv_p=last["p"],
        w3=w3.reshape(base_channels, C2) * scale3[:, None],
        b3=(be3 - mu3 * scale3)[:, None],
        w4=w4.reshape(1, base_channels),
        b4=b4.reshape(1, 1),
        fc1_kron=fc1_kron, fc1_b_t=jnp.tile(fc1_b, (N,))[None, :],
        fc2_kron=fc2_kron, fc2_b_t=jnp.tile(fc2_b, (N,))[None, :],
    )
    params = dict(conv_stack=conv_stack, head=head, vmem_limit=vmem_limit)

    out = jax.block_until_ready(discriminator_forward(x, params))

    # --- pure-JAX f32 reference ---------------------------------------------
    def reference(xi):
        h = xi
        for lc in raw_convs:
            h = lax.conv_general_dilated(
                h, lc["w"], (lc["s"], lc["s"]), [(lc["p"], lc["p"])] * 2,
                dimension_numbers=("NCHW", "OIHW", "NCHW"))
            sc = lc["gamma"] / jnp.sqrt(lc["var"] + BN_EPS)
            h = h * sc[None, :, None, None] + (lc["beta"] - lc["mean"] * sc)[None, :, None, None]
            h = jnp.where(h >= 0, h, LEAKY_SLOPE * h)
        h = lax.conv_general_dilated(h, w3, (1, 1), [(0, 0), (0, 0)],
                                     dimension_numbers=("NCHW", "OIHW", "NCHW"))
        h = h * scale3[None, :, None, None] + (be3 - mu3 * scale3)[None, :, None, None]
        h = jnp.where(h >= 0, h, LEAKY_SLOPE * h)
        h = lax.conv_general_dilated(h, w4, (1, 1), [(0, 0), (0, 0)],
                                     dimension_numbers=("NCHW", "OIHW", "NCHW"))
        h = h + b4[None, :, None, None]
        v = h.reshape(N, P)
        z = v @ fc1_w.T + fc1_b
        z = z @ fc2_w.T + fc2_b
        return jnp.tanh(z)

    ref = reference(x)
    assert out.shape == (N, 1), out.shape
    err = float(jnp.max(jnp.abs(out - ref)))
    assert jnp.allclose(out, ref, atol=1e-2, rtol=1e-2), err

    print("KERNEL_OK")
</pallas_src>

<mosaic_0001>
module attributes {stable_mosaic.version = 11 : i64} {
  func.func @_convT_kernel(%arg0: i32, %arg1: memref<32x256xbf16, #tpu.memory_space<vmem>>, %arg2: memref<8x32xbf16, #tpu.memory_space<vmem>>, %arg3: memref<8x256xf32, #tpu.memory_space<vmem>>) attributes {dimension_semantics = [#tpu.dimension_semantics<parallel>], iteration_bounds = array<i64: 2>, scalar_prefetch = 0 : i64, scratch_operands = 0 : i64, tpu.core_type = #tpu.core_type<tc>, window_params = [{transform_indices = @transform_0, window_bounds = array<i64: 32, 256>}, {pipeline_mode = #tpu.pipeline_mode<synchronous>, transform_indices = @transform_1, window_bounds = array<i64: 8, 32>}, {transform_indices = @transform_2, window_bounds = array<i64: 8, 256>}]} {
    %c0 = arith.constant 0 : index
    %c0_0 = arith.constant 0 : index
    %0 = vector.load %arg2[%c0, %c0_0] : memref<8x32xbf16, #tpu.memory_space<vmem>>, vector<8x32xbf16>
    %c0_1 = arith.constant 0 : index
    %c0_2 = arith.constant 0 : index
    %1 = vector.load %arg1[%c0_1, %c0_2] : memref<32x256xbf16, #tpu.memory_space<vmem>>, vector<32x256xbf16>
    %cst = arith.constant dense<0.000000e+00> : vector<8x256xf32>
    %2 = tpu.matmul %0, %1, %cst {dimension_numbers = #tpu.dot_dimension_numbers<[1], [0], [0], [1], [0, 0, 1, 1], [], []>} : vector<8x32xbf16>, vector<32x256xbf16>, vector<8x256xf32> -> vector<8x256xf32>
    %cst_3 = arith.constant 0.000000e+00 : f32
    %3 = vector.broadcast %cst_3 : f32 to vector<8x256xf32>
    %4 = arith.cmpf oge, %2, %3 : vector<8x256xf32>
    %cst_4 = arith.constant 2.000000e-01 : f32
    %5 = vector.broadcast %cst_4 : f32 to vector<8x256xf32>
    %6 = arith.mulf %5, %2 : vector<8x256xf32>
    %7 = arith.select %4, %2, %6 : vector<8x256xi1>, vector<8x256xf32>
    %c0_5 = arith.constant 0 : index
    %c0_6 = arith.constant 0 : index
    %8 = vector.load %arg3[%c0_5, %c0_6] : memref<8x256xf32, #tpu.memory_space<vmem>>, vector<8x256xf32>
    tpu.vector_store %arg3[%c0_5, %c0_6], %7 {strides = array<i32>} : memref<8x256xf32, #tpu.memory_space<vmem>>, vector<8x256xf32>,
    return
  }
  func.func @transform_0(%arg0: i32) -> (i32, i32) {
    %c0_i32 = arith.constant 0 : i32
    %c0_i32_0 = arith.constant 0 : i32
    return %c0_i32, %arg0 : i32, i32
  }
  func.func @transform_1(%arg0: i32) -> (i32, i32) {
    %c0_i32 = arith.constant 0 : i32
    %c0_i32_0 = arith.constant 0 : i32
    %c0_i32_1 = arith.constant 0 : i32
    return %c0_i32, %c0_i32_0 : i32, i32
  }
  func.func @transform_2(%arg0: i32) -> (i32, i32) {
    %c0_i32 = arith.constant 0 : i32
    %c0_i32_0 = arith.constant 0 : i32
    return %c0_i32, %arg0 : i32, i32
  }
}

</mosaic_0001>

<bundles_post_ra>
// kernel: tpu_custom_call.1
= control target key start
LH: loop header
LB: loop body
LE: loop exit
PB: predicated region body
PF: predicated region fallthrough
CT: control target
= control target key end

     0   :  { %7 = vsyncpa [#allocation3], 0  ;;  %s790_s0 = inlined_call_operand.hbm [shape: bf16[32,512], index: 0, kind: input, shape index: {}]   ;;  %s791_s1 = inlined_call_operand.hbm [shape: bf16[8,32], index: 1, kind: input, shape index: {}]   ;;  %s792_s2 = inlined_call_operand.hbm [shape: f32[8,512], index: 2, kind: output, shape index: {}]  }
   0x1   :  { %9 = vsyncpa [#allocation3 + $0x1], 0 }
   0x2   :  { %10 = vsyncpa [#allocation6], 0 }
   0x3   :  { %11 = vsyncpa [#allocation4], 0 }
   0x4   :  { %13 = vsyncpa [#allocation4 + $0x1], 0  ;;  %s593_s9 = smov 0   ;;  %s595_s10 = smov 0  }
   0x5   :  { %s597_s11 = smov 0   ;;  %s599_s12 = smov 0  }
   0x6 LB: > { %s614_s13 = sadd.s32 4294967295, %s569_s12   ;;  %s351_s14 = sadd.s32 4294967294, %s569_s12   ;;  %s569_s12 = sphi %s599_s12, %s817_s12   ;;  %s565_s11 = sphi %s597_s11, %s816_s11   ;;  %s561_s10 = sphi %s595_s10, %s815_s10   ;;  %s557_s9 = sphi %s593_s9, %s814_s9  }
   0x7   : > { %s618_s15 = sadd.s32 1, %s569_s12   ;;  %s26_s16 = sadd.s32 1, %s565_s11 }
   0x8   : > { %s23_s17 = ssub.s32 %s569_s12, %s618_s15  ;;  %p33_p0 = scmp.ne.s32.totalorder %s565_s11, %s561_s10 }
   0x9   : > { %p24_p1 = scmp.eq.s32.totalorder %s23_s17, 0  ;;  %p34_p2 = scmp.eq.s32.totalorder %s569_s12, 0 }
   0xa   : > { %p39_p3 = scmp.ne.s32.totalorder %s561_s10, %s557_s9  ;;  %p793_p4 = scmp.eq.s32.totalorder %s614_s13, 0 }
   0xb   : > { %s630_s18 = scalar_select %p24_p1, %s565_s11, %s26_s16  }
   0xc   : > { %p632_p5 = por %p34_p2, %p33_p0  ;;  %p638_p6 = por %p793_p4, %p39_p3 }
   0xd   : > { %p84_p7 = scmp.eq.s32.totalorder %s614_s13, 1  ;;  %p90_p8 = scmp.eq.s32.totalorder %s351_s14, 1 }
   0xe   : > { %s799_s20 = scalar_select %p638_p6, 1, 0 }
   0xf   : > { %p352_p9 = scmp.ge.s32.totalorder %s569_s12, 1  ;;  %p97_p10 = scmp.lt.s32.totalorder %s569_s12, 3 }
  0x10   : > { %p645_p11 = por %p84_p7, %p33_p0  ;;  %p649_p12 = por %p90_p8, %p39_p3 }
  0x11   : > { %p653_p13 = pnand %p352_p9, %p97_p10  ;;  %s571_s24 = smov [#allocation5]  }
  0x12   : > { %s800_s21 = scalar_select %p645_p11, 1, 0 }
  0x13   : > { %s801_s22 = scalar_select %p649_p12, 1, 0 }
  0x14   : > { %s802_s23 = scalar_select %p653_p13, 1, 0 }
  0x15   : > { %p382_p2 = pneg %p653_p13  ;;  %s110_s25 = sshll.u32 %s571_s24, 4  ;;  %s111_s25 = int_to_ptr.vmem [resolvable:$true] %s110_s25 }
  0x16   : > { %p395_p4 = scmp.lt.s32.totalorder %s569_s12, 2  ;;  %p803_p0 = scmp.eq.s32.totalorder %s614_s13, 0 }
  0x17   : > { %s121_s27 = sand.u32 1, %s565_s11   ;;  %s441_s4 = scalar_lea.hbm %s791_s1, 64 }
  0x18   : > { %p663_p7 = pnand %p382_p2, %p803_p0  ;;  %p670_p3 = pnand %p395_p4, %p632_p5 }
  0x19   : > { %s355_s29 = sshll.u32 %s121_s27, 5  ;;  %p442_p8 = scmp.ne.s32.totalorder %s791_s1, %s441_s4 }
  0x1a   : > { %s805_s28 = scalar_select %p670_p3, 1, 0 }
  0x1b   : > { %p443_p9 = pneg %p663_p7  ;;  %p448_p4 = scmp.lt.u32.totalorder %s441_s4, %s791_s1 }
  0x1d   : > { %p444_p10 = pnand %p443_p9, %p442_p8 }
  0x1f   : > { %p445_p2 = pneg %p444_p10 }
  0x21   : > { %p450_p5 = pnand %p448_p4, %p445_p2 }
  0x23   : > { %453 = shalt.err (!%p450_p5)
}
  0x24   : > { %s454_s14 = scalar_lea.vmem %s111_s25, 64  ;;  %p462_p11 = scmp.lt.s32.totalorder %s111_s25, %s111_s25 }
  0x25   : > { %p455_p0 = scmp.ne.s32.totalorder %s111_s25, %s454_s14  ;;  %p463_p6 = scmp.lt.s32.totalorder %s454_s14, %s454_s14 }
  0x27   : > { %p457_p1 = pnand %p455_p0, %p443_p9  ;;  %p464_p13 = por %p463_p6, %p462_p11 }
  0x29   : > { %p458_p12 = pneg %p457_p1 }
  0x2b   : > { %p465_p3 = pnand %p464_p13, %p458_p12 }
  0x2d   : > { %468 = shalt.err (!%p465_p3)
}
  0x2e   : > { %385 = dma.hbm_to_vmem [thread:$0]  (!%p663_p7), %s791_s1, 64, %s111_s25, [#allocation6]  }
  0x2f   : > { %s372_s19 = sshll.u32 %s569_s12, 7  ;;  %s125_s24 = scalar_lea.vmem [#allocation2], %s355_s29 }
  0x30   : > { %s132_s30 = sshll.u32 %s125_s24, 4  ;;  %s694_s5 = scalar_lea.hbm %s790_s0, %s372_s19  ;;  %s696_s30 = int_to_ptr.vmem [resolvable:$true] %s132_s30 }
  0x31   : > { %s698_s26 = scalar_lea.sflag [#allocation3], %s121_s27  ;;  %s469_s6 = scalar_lea.hbm %s694_s5, 512 }
  0x32   : > { %p470_p6 = scmp.ne.s32.totalorder %s694_s5, %s469_s6  ;;  %p806_p11 = scmp.ne.s32.totalorder %s805_s28, 0 }
  0x33   : > { %s474_s7 = scalar_lea.hbm %s790_s0, 1024  ;;  %p475_p7 = scmp.lt.u32.totalorder %s694_s5, %s790_s0 }
  0x34   : > { %p471_p12 = pneg %p806_p11  ;;  %p476_p3 = scmp.lt.u32.totalorder %s474_s7, %s469_s6 }
  0x35   : > { %p478_p9 = scmp.lt.u32.totalorder %s469_s6, %s694_s5 }
  0x36   : > { %p472_p13 = pnand %p471_p12, %p470_p6  ;;  %p477_p8 = por %p476_p3, %p475_p7 }
  0x38   : > { %p473_p1 = pneg %p472_p13  ;;  %p479_p10 = por %p478_p9, %p477_p8 }
  0x3a   : > { %p480_p2 = pnand %p479_p10, %p473_p1 }
  0x3c   : > { %483 = shalt.err (!%p480_p2)
}
  0x3d   : > { %s484_s27 = scalar_lea.vmem %s696_s30, 512  ;;  %s572_s16 = smov [#allocation2]  }
  0x3e   : > { %p485_p4 = scmp.ne.s32.totalorder %s696_s30, %s484_s27  ;;  %s489_s17 = sshll.u32 %s572_s16, 4  ;;  %s490_s17 = int_to_ptr.vmem [resolvable:$false] %s489_s17 }
  0x3f   : > { %s491_s19 = scalar_lea.vmem %s490_s17, 1024  ;;  %p492_p6 = scmp.lt.s32.totalorder %s696_s30, %s490_s17 }
  0x40   : > { %p487_p5 = pnand %p485_p4, %p471_p12  ;;  %p493_p13 = scmp.lt.s32.totalorder %s491_s19, %s484_s27 }
  0x42   : > { %p488_p0 = pneg %p487_p5  ;;  %p494_p7 = por %p493_p13, %p492_p6 }
  0x44   : > { %p495_p3 = pnand %p494_p7, %p488_p0 }
  0x46   : > { %498 = shalt.err (!%p495_p3)
}
  0x47   : > { %s573_s24 = smov 256   ;;  %s574_s3 = smov 128  }
  0x48   : > { %s575_s4 = smov 8   ;;  %p807_p12 = scmp.ne.s32.totalorder %s802_s23, 0 }
  0x49   : > { %389 = dma.hbm_to_vmem [thread:$0]  (!%p806_p11), %s694_s5, 512, %s696_s30, %s698_s26, %s573_s24, %s574_s3, %s575_s4  }
  0x4a   : > { %144 = sbr.rel (%p807_p12) target bundleno = 324 (0x144), region = 28  ;;  %s729_s6 = sand.u32 (!%p807_p12), 1, %s561_s10  }
  0x4b   : > { %s359_s25 = sshll.u32 (!%p807_p12), %s729_s6, 5  ;;  %s147_s29 = scalar_lea.sflag (!%p807_p12), [#allocation3], %s729_s6 }
  0x4c   : > { %s150_s7 = scalar_lea.vmem (!%p807_p12), [#allocation2], %s359_s25  ;;  %p808_p1 = scmp.ne.s32.totalorder (!%p807_p12), %s799_s20, 0 }
  0x51   : > { %544 = dma.done.wait (%p808_p1), %s147_s29, 512  }
  0x52   : > { %546 = vsyncadd (%p808_p1), %s147_s29, 4294966784  ;;  %p809_p8 = scmp.eq.s32.totalorder %s614_s13, 0 }
  0x54   : > { %548 = dma.done.wait (%p809_p8), [#allocation6], 64   ;;  %p810_p11 = pmov %p809_p8 }
  0x55   : > { %v576_v0 = vmov 0   ;;  %v435_v1 = vld [vmem:[%s150_s7 + $0x4] ss:$8 sps:$4 sm:$0xff]   ;;  %v437_v2 = vld [vmem:[%s150_s7] ss:$8 sps:$4 sm:$0xff]   ;;  %vm203_vm0 = vcmask 261120  }
  0x56   : > { %550 = vsyncadd (%p810_p11), [#allocation6], 4294967232  ;;  %239 = vmatprep.mubr.bf16.mxu0 %v576_v0  ;;  %207 = vmatprep.subr.bf16.mxu0 %v435_v1  ;;  %v438_v3 = vld [vmem:[%s150_s7 + $0x14] ss:$8 sps:$4 sm:$0xff]   ;;  %v440_v4 = vld [vmem:[%s150_s7 + $0x10] ss:$8 sps:$4 sm:$0xff]  }
  0x57   : > { %208 = vmatpush1.bf16.msra.mxu0 %v437_v2  ;;  %v178_v5 = vld [vmem:[#allocation5] sm:$0xf]  ;;  %s361_s20 = sshll.u32 %s729_s6, 4  ;;  %s373_s23 = sshll.u32 %s614_s13, 8 }
  0x58   : > { %209 = vmatprep.subr.bf16.mxu0 %v438_v3  ;;  %s174_s28 = scalar_lea.vmem [#allocation7], %s361_s20  ;;  %s746_s8 = scalar_lea.hbm %s792_s2, %s373_s23 }
  0x59   : > { %s271_s30 = sshll.u32 %s174_s28, 4  ;;  %s257_s13 = scalar_lea.sflag [#allocation4], %s729_s6  ;;  %s748_s30 = int_to_ptr.vmem [resolvable:$true] %s271_s30 }
  0x5a   : > { %s499_s14 = scalar_lea.vmem %s748_s30, 256  ;;  %p811_p10 = scmp.ne.s32.totalorder %s800_s21, 0 }
  0x5b   : > { %210 = vmatpush1.bf16.msra.mxu0 %v440_v4  ;;  %p500_p9 = scmp.ne.s32.totalorder %s748_s30, %s499_s14  ;;  %s577_s27 = smov [#allocation7]  }
  0x5c   : > { %s503_s16 = sshll.u32 %s577_s27, 4  ;;  %s504_s16 = int_to_ptr.vmem [resolvable:$false] %s503_s16 }
  0x5d   : > { %p501_p2 = pnand %p500_p9, %p811_p10  ;;  %s505_s17 = scalar_lea.vmem %s504_s16, 512 }
  0x5e   : > { %366 = vmatmul.mubr.msk.bf16.vlgmr.msra.gmra.mrb[0].mxu0 %vm203_vm0, %v178_v5  ;;  %p506_p5 = scmp.lt.s32.totalorder %s748_s30, %s504_s16  ;;  %p507_p0 = scmp.lt.s32.totalorder %s505_s17, %s499_s14 }
  0x5f   : > { %p502_p4 = pneg %p501_p2 }
  0x60   : > { %p508_p6 = por %p507_p0, %p506_p5 }
  0x62   : > { %p509_p13 = pnand %p508_p6, %p502_p4 }
 0x131   : > { %v241_v6 = vpop.f32.mrb[0].mxu0 }
 0x132   : > { %vm248_vm1 = vcmp.ge.f32.partialorder %v241_v6, 0.0  ;;  %v250_v7 = vmul.f32 0.2, %v241_v6  ;;  %v243_v8 = vpop.f32.mrb[1].mxu0 }
 0x133   : > { %vm249_vm2 = vcmp.ge.f32.partialorder %v243_v8, 0.0  ;;  %v251_v9 = vmul.f32 0.2, %v243_v8  ;;  %v245_v10 = vpop.f32.mrb[2].mxu0 }
 0x134   : > { %v252_v11 = vsel %vm248_vm1, %v241_v6, %v250_v7  ;;  %v246_v12 = vpop.f32.mrb[3].mxu0 }
 0x135   : > { %254 = vst [vmem:[%s174_s28] sm:$0xff] %v252_v11  ;;  %v253_v13 = vsel %vm249_vm2, %v243_v8, %v251_v9 }
 0x136   : > { %255 = vst [vmem:[%s174_s28 + $0x8] sm:$0xff] %v253_v13 }
 0x137   : > { %512 = shalt.err (!%p509_p13)
}
 0x138   : > { %s513_s19 = scalar_lea.hbm %s746_s8, 256  ;;  %s517_s4 = scalar_lea.hbm %s792_s2, 512 }
 0x139   : > { %p514_p7 = scmp.ne.s32.totalorder %s746_s8, %s513_s19  ;;  %p518_p1 = scmp.lt.u32.totalorder %s746_s8, %s792_s2 }
 0x13a   : > { %p519_p8 = scmp.lt.u32.totalorder %s517_s4, %s513_s19  ;;  %p521_p9 = scmp.lt.u32.totalorder %s513_s19, %s746_s8 }
 0x13b   : > { %p515_p3 = pnand %p514_p7, %p811_p10 }
 0x13c   : > { %p520_p11 = por %p519_p8, %p518_p1 }
 0x13d   : > { %p516_p12 = pneg %p515_p3 }
 0x13e   : > { %p522_p2 = por %p521_p9, %p520_p11 }
 0x140   : > { %p523_p4 = pnand %p522_p2, %p516_p12 }
 0x142   : > { %526 = shalt.err (!%p523_p4)
}
 0x143   : > { %380 = dma.vmem_to_hbm [thread:$0]  (%p811_p10), %s748_s30, 256, %s746_s8, %s257_s13  }
 0x144 PF: > { %s283_s29 = sand.u32 1, %s557_s9   ;;  %p812_p5 = scmp.ne.s32.totalorder %s801_s22, 0 }
 0x145   : > { %p813_p0 = scmp.ge.s32.totalorder %s569_s12, 2  ;;  %s284_s7 = scalar_lea.sflag [#allocation4], %s283_s29 }
 0x147   : > { %p391_p6 = pnand %p813_p0, %p812_p5 }
 0x149   : > { %552 = dma.done.wait (!%p391_p6), %s284_s7, 256  }
 0x14a   : > { %554 = vsyncadd (!%p391_p6), %s284_s7, 4294967040  ;;  %p16_p13 = scmp.ge.s32.totalorder %s618_s15, 4   ;;  %s814_s9 = smov %s561_s10 }
 0x14b   : > { %s815_s10 = smov %s565_s11  ;;  %s816_s11 = smov %s630_s18 }
 0x14c   : > { %s817_s12 = smov %s618_s15  ;;  %18 = sbr.rel (!%p16_p13) target bundleno = 6 (0x6), region = 77 }
 0x153   :  { %289 = vsyncpa [#allocation3], 1 }
 0x154   :  { %291 = vsyncpa [#allocation3 + $0x1], 1 }
 0x155   :  { %292 = vsyncpa [#allocation6], 1 }
 0x156   :  { %293 = vsyncpa [#allocation4], 1 }
 0x157   :  { %295 = vsyncpa [#allocation4 + $0x1], 1 }

</bundles_post_ra>
